<compile_context>
chip_gen: v7x
topology: tpu7x:2x2x1
jax: 0.10.0
libtpu: 0.0.40
codegen_flags: <defaults>
</compile_context>

<pallas_src>
import functools

import jax
import jax.numpy as jnp
from jax import lax
from jax.experimental import pallas as pl
from jax.experimental.pallas import tpu as pltpu


def _convnet_kernel(w_ref, thr_ref, x_ref, o_ref, carry_ref, tapw_ref, *,
                    kh, kw, H, W, steepness):
    """One (batch-block, layer) grid step.

    w_ref     : SMEM (kh*kw,) f32          -- flattened conv taps
    thr_ref   : SMEM (1,)     f32          -- threshold
    x_ref     : VMEM (H, TB*W) f32         -- packed input block (batch on lanes)
    o_ref     : VMEM (1, H, TB*W) f32      -- this layer's output block
    carry_ref : VMEM (H, TB*W) f32         -- running activation across layers
    tapw_ref  : VMEM (kh*kw, H, TB*W) f32  -- boundary-masked tap-weight planes
    """
    layer = pl.program_id(1)
    LW = x_ref.shape[1]

    @pl.when(layer == 0)
    def _init():
        # Pre-multiply the per-image zero-padding boundary mask into each tap
        # weight, once per batch block; the per-layer loop then has no
        # compares/selects on the VALU slot.
        row = lax.broadcasted_iota(jnp.int32, (H, LW), 0)
        col = lax.broadcasted_iota(jnp.int32, (H, LW), 1) % W   # per-image column
        for u in range(kh):
            du = u - kh // 2
            for v in range(kw):
                dv = v - kw // 2
                valid = ((row + du >= 0) & (row + du < H) &
                         (col + dv >= 0) & (col + dv < W))
                tapw_ref[u * kw + v] = jnp.where(valid, w_ref[u * kw + v], 0.0)
        carry_ref[...] = x_ref[...]

    x = carry_ref[...]
    acc = jnp.zeros((H, LW), jnp.float32)
    for u in range(kh):                       # static (kh*kw)-tap stencil
        du = u - kh // 2
        for v in range(kw):
            dv = v - kw // 2
            # shifted[i, j] = x[i + du, j + dv] (circular); wrapped / cross-image
            # elements are zeroed because the mask is baked into tapw.
            shifted = x
            if du != 0:
                shifted = jnp.roll(shifted, shift=-du, axis=0)   # XLU sublane rot
            if dv != 0:
                shifted = jnp.roll(shifted, shift=-dv, axis=1)   # XLU lane rot
            acc = acc + shifted * tapw_ref[u * kw + v]
    y = jax.nn.sigmoid(steepness * (acc - thr_ref[0]))
    carry_ref[...] = y
    o_ref[0] = y


def _pick_batch_block(N, W, H):
    """Largest divisor TB of N whose lane width TB*W is a multiple of 128 and
    whose (H, TB*W) f32 plane stays within a small VMEM budget."""
    budget_bytes = 512 * 1024
    best = None
    for tb in range(1, N + 1):
        if N % tb:
            continue
        lanes = tb * W
        if lanes % 128 == 0 and H * lanes * 4 <= budget_bytes:
            best = tb
    # Fallback: whole batch as a single full-extent block (always legal).
    return best if best is not None else N


def flexible_convnet_forward(x, kernel, threshold, num_layers, steepness=100.0):
    """x: (N, 1, H, W) f32.  Returns list of num_layers arrays of shape (N,1,H,W)."""
    N, C, H, W = x.shape
    assert C == 1, "shared kernel is (1,1,kh,kw): input must have 1 channel"
    kh, kw = kernel.shape

    # Pack batch along the lane axis: (H, N*W); image n owns columns
    # [n*W, (n+1)*W).  Lane-dense layout for both VPU ops and stores.
    x_packed = jnp.transpose(x[:, 0].astype(jnp.float32), (1, 0, 2)).reshape(H, N * W)
    w_flat = jnp.asarray(kernel, jnp.float32).reshape(-1)      # (kh*kw,)
    thr = jnp.asarray([threshold], jnp.float32)                # (1,)

    TB = _pick_batch_block(N, W, H)
    # TODO(synk): add spatial (H) tiling with halo exchange for very large
    # images; currently each block carries the full image height.

    body = functools.partial(_convnet_kernel, kh=kh, kw=kw, H=H, W=W,
                             steepness=float(steepness))

    out = pl.pallas_call(
        body,
        out_shape=jax.ShapeDtypeStruct((num_layers, H, N * W), jnp.float32),
        grid_spec=pltpu.PrefetchScalarGridSpec(
            num_scalar_prefetch=0,
            grid=(N // TB, num_layers),                 # (batch blocks, layers)
            in_specs=[
                pl.BlockSpec(memory_space=pltpu.MemorySpace.SMEM),  # conv taps
                pl.BlockSpec(memory_space=pltpu.MemorySpace.SMEM),  # threshold
                # Same block index across the layer axis -> fetched once per block.
                pl.BlockSpec((H, TB * W), lambda b, l: (0, b)),
            ],
            out_specs=pl.BlockSpec((1, H, TB * W), lambda b, l: (l, 0, b)),
            scratch_shapes=[
                pltpu.VMEM((H, TB * W), jnp.float32),            # layer carry
                pltpu.VMEM((kh * kw, H, TB * W), jnp.float32),   # masked tap weights
            ],
        ),
        compiler_params=pltpu.CompilerParams(
            dimension_semantics=("parallel", "arbitrary"),
            vmem_limit_bytes=48 * 1024 * 1024,
        ),
    )(w_flat, thr, x_packed)

    # Unpack lanes -> (num_layers, N, 1, H, W) with one reshape/transpose,
    # then slice into the per-layer list the PyTorch module returns.
    out = out.reshape(num_layers, H, N, W)
    out = jnp.transpose(out, (0, 2, 1, 3))[:, :, None, :, :]
    return [out[l] for l in range(num_layers)]


def _reference_forward(x, kernel, threshold, num_layers, steepness=100.0):
    """Pure-JAX reference mirroring nn.functional.conv2d(padding='same')."""
    w = jnp.asarray(kernel, jnp.float32)[None, None]        # (1,1,kh,kw) OIHW
    outs = []
    for _ in range(num_layers):
        x = lax.conv_general_dilated(
            x, w, window_strides=(1, 1), padding="SAME",
            dimension_numbers=("NCHW", "OIHW", "NCHW"))
        x = jax.nn.sigmoid(steepness * (x - threshold))
        outs.append(x)
    return outs


if __name__ == "__main__":
    # Deterministic "checkpoint": 3x3 smoothing kernel, threshold, steepness.
    num_layers = 3
    kernel = jnp.array([[1.0, 2.0, 1.0],
                        [2.0, 4.0, 2.0],
                        [1.0, 2.0, 1.0]], jnp.float32) / 16.0
    threshold = 0.5
    steepness = 100.0

    key = jax.random.PRNGKey(0)
    x = jax.random.uniform(key, (2, 1, 16, 16), dtype=jnp.float32)

    outs = flexible_convnet_forward(x, kernel, threshold, num_layers, steepness)
    outs = [jax.block_until_ready(o) for o in outs]

    refs = _reference_forward(x, kernel, threshold, num_layers, steepness)
    for o, r in zip(outs, refs):
        assert o.shape == r.shape and o.dtype == r.dtype
        assert jnp.max(jnp.abs(o - r)) < 5e-3, "mismatch vs reference"

    print("KERNEL_OK")
</pallas_src>

<mosaic_0001>
module attributes {stable_mosaic.version = 11 : i64} {
  func.func @_convnet_kernel(%arg0: i32, %arg1: i32, %arg2: memref<9xf32, #tpu.memory_space<smem>>, %arg3: memref<1xf32, #tpu.memory_space<smem>>, %arg4: memref<16x32xf32, #tpu.memory_space<vmem>>, %arg5: memref<1x16x32xf32, #tpu.memory_space<vmem>>, %arg6: memref<16x32xf32, #tpu.memory_space<vmem>>, %arg7: memref<9x16x32xf32, #tpu.memory_space<vmem>>) attributes {dimension_semantics = [#tpu.dimension_semantics<parallel>, #tpu.dimension_semantics<arbitrary>], iteration_bounds = array<i64: 1, 3>, scalar_prefetch = 0 : i64, scratch_operands = 2 : i64, tpu.core_type = #tpu.core_type<tc>, window_params = [{transform_indices = @transform_0, window_bounds = array<i64: 9>}, {transform_indices = @transform_1, window_bounds = array<i64: 1>}, {transform_indices = @transform_2, window_bounds = array<i64: 16, 32>}, {transform_indices = @transform_3, window_bounds = array<i64: 1, 16, 32>}]} {
    %c0_i32 = arith.constant 0 : i32
    %0 = arith.cmpi eq, %arg1, %c0_i32 : i32
    %1 = arith.extui %0 : i1 to i32
    %c0_i32_0 = arith.constant 0 : i32
    %2 = arith.cmpi ne, %1, %c0_i32_0 : i32
    scf.if %2 {
      %91 = tpu.iota {dimensions = array<i32: 0>} : vector<16x32xi32>
      %92 = tpu.iota {dimensions = array<i32: 1>} : vector<16x32xi32>
      %c16_i32 = arith.constant 16 : i32
      %c0_i32_29 = arith.constant 0 : i32
      %93 = arith.cmpi eq, %c16_i32, %c0_i32_29 : i32
      %c1_i32 = arith.constant 1 : i32
      %94 = arith.select %93, %c1_i32, %c16_i32 : i32
      %95 = vector.broadcast %94 : i32 to vector<16x32xi32>
      %96 = arith.remsi %92, %95 : vector<16x32xi32>
      %c0_i32_30 = arith.constant 0 : i32
      %97 = vector.broadcast %c0_i32_30 : i32 to vector<16x32xi32>
      %98 = arith.cmpi ne, %96, %97 : vector<16x32xi32>
      %c0_i32_31 = arith.constant 0 : i32
      %99 = vector.broadcast %c0_i32_31 : i32 to vector<16x32xi32>
      %100 = arith.cmpi slt, %96, %99 : vector<16x32xi32>
      %c0_i32_32 = arith.constant 0 : i32
      %101 = arith.cmpi slt, %94, %c0_i32_32 : i32
      %102 = vector.broadcast %101 : i1 to vector<16x32xi1>
      %103 = vector.broadcast %102 : vector<16x32xi1> to vector<16x32xi1>
      %104 = arith.xori %100, %103 : vector<16x32xi1>
      %105 = arith.andi %104, %98 : vector<16x32xi1>
      %106 = vector.broadcast %94 : i32 to vector<16x32xi32>
      %107 = arith.addi %96, %106 : vector<16x32xi32>
      %108 = arith.select %105, %107, %96 : vector<16x32xi1>, vector<16x32xi32>
      %c-1_i32 = arith.constant -1 : i32
      %109 = vector.broadcast %c-1_i32 : i32 to vector<16x32xi32>
      %110 = arith.addi %91, %109 : vector<16x32xi32>
      %c0_i32_33 = arith.constant 0 : i32
      %111 = vector.broadcast %c0_i32_33 : i32 to vector<16x32xi32>
      %112 = arith.cmpi sge, %110, %111 : vector<16x32xi32>
      %c-1_i32_34 = arith.constant -1 : i32
      %113 = vector.broadcast %c-1_i32_34 : i32 to vector<16x32xi32>
      %114 = arith.addi %91, %113 : vector<16x32xi32>
      %c16_i32_35 = arith.constant 16 : i32
      %115 = vector.broadcast %c16_i32_35 : i32 to vector<16x32xi32>
      %116 = arith.cmpi slt, %114, %115 : vector<16x32xi32>
      %117 = arith.andi %112, %116 : vector<16x32xi1>
      %c-1_i32_36 = arith.constant -1 : i32
      %118 = vector.broadcast %c-1_i32_36 : i32 to vector<16x32xi32>
      %119 = arith.addi %108, %118 : vector<16x32xi32>
      %c0_i32_37 = arith.constant 0 : i32
      %120 = vector.broadcast %c0_i32_37 : i32 to vector<16x32xi32>
      %121 = arith.cmpi sge, %119, %120 : vector<16x32xi32>
      %122 = arith.andi %117, %121 : vector<16x32xi1>
      %c-1_i32_38 = arith.constant -1 : i32
      %123 = vector.broadcast %c-1_i32_38 : i32 to vector<16x32xi32>
      %124 = arith.addi %108, %123 : vector<16x32xi32>
      %c16_i32_39 = arith.constant 16 : i32
      %125 = vector.broadcast %c16_i32_39 : i32 to vector<16x32xi32>
      %126 = arith.cmpi slt, %124, %125 : vector<16x32xi32>
      %127 = arith.andi %122, %126 : vector<16x32xi1>
      %c0_40 = arith.constant 0 : index
      %128 = memref.load %arg2[%c0_40] : memref<9xf32, #tpu.memory_space<smem>>
      %cst_41 = arith.constant 0.000000e+00 : f32
      %129 = vector.broadcast %128 : f32 to vector<16x32xf32>
      %130 = vector.broadcast %cst_41 : f32 to vector<16x32xf32>
      %131 = arith.select %127, %129, %130 : vector<16x32xi1>, vector<16x32xf32>
      %c0_42 = arith.constant 0 : index
      %c0_43 = arith.constant 0 : index
      %c0_44 = arith.constant 0 : index
      %132 = vector.load %arg7[%c0_42, %c0_43, %c0_44] : memref<9x16x32xf32, #tpu.memory_space<vmem>>, vector<1x16x32xf32>
      %133 = vector.shape_cast %132 : vector<1x16x32xf32> to vector<16x32xf32>
      %134 = vector.shape_cast %131 : vector<16x32xf32> to vector<1x16x32xf32>
      tpu.vector_store %arg7[%c0_42, %c0_43, %c0_44], %134 {strides = array<i32>} : memref<9x16x32xf32, #tpu.memory_space<vmem>>, vector<1x16x32xf32>,
      %c-1_i32_45 = arith.constant -1 : i32
      %135 = vector.broadcast %c-1_i32_45 : i32 to vector<16x32xi32>
      %136 = arith.addi %91, %135 : vector<16x32xi32>
      %c0_i32_46 = arith.constant 0 : i32
      %137 = vector.broadcast %c0_i32_46 : i32 to vector<16x32xi32>
      %138 = arith.cmpi sge, %136, %137 : vector<16x32xi32>
      %c-1_i32_47 = arith.constant -1 : i32
      %139 = vector.broadcast %c-1_i32_47 : i32 to vector<16x32xi32>
      %140 = arith.addi %91, %139 : vector<16x32xi32>
      %c16_i32_48 = arith.constant 16 : i32
      %141 = vector.broadcast %c16_i32_48 : i32 to vector<16x32xi32>
      %142 = arith.cmpi slt, %140, %141 : vector<16x32xi32>
      %143 = arith.andi %138, %142 : vector<16x32xi1>
      %c0_i32_49 = arith.constant 0 : i32
      %144 = vector.broadcast %c0_i32_49 : i32 to vector<16x32xi32>
      %145 = arith.addi %108, %144 : vector<16x32xi32>
      %c0_i32_50 = arith.constant 0 : i32
      %146 = vector.broadcast %c0_i32_50 : i32 to vector<16x32xi32>
      %147 = arith.cmpi sge, %145, %146 : vector<16x32xi32>
      %148 = arith.andi %143, %147 : vector<16x32xi1>
      %c0_i32_51 = arith.constant 0 : i32
      %149 = vector.broadcast %c0_i32_51 : i32 to vector<16x32xi32>
      %150 = arith.addi %108, %149 : vector<16x32xi32>
      %c16_i32_52 = arith.constant 16 : i32
      %151 = vector.broadcast %c16_i32_52 : i32 to vector<16x32xi32>
      %152 = arith.cmpi slt, %150, %151 : vector<16x32xi32>
      %153 = arith.andi %148, %152 : vector<16x32xi1>
      %c1_53 = arith.constant 1 : index
      %154 = memref.load %arg2[%c1_53] : memref<9xf32, #tpu.memory_space<smem>>
      %cst_54 = arith.constant 0.000000e+00 : f32
      %155 = vector.broadcast %154 : f32 to vector<16x32xf32>
      %156 = vector.broadcast %cst_54 : f32 to vector<16x32xf32>
      %157 = arith.select %153, %155, %156 : vector<16x32xi1>, vector<16x32xf32>
      %c1_55 = arith.constant 1 : index
      %c0_56 = arith.constant 0 : index
      %c0_57 = arith.constant 0 : index
      %158 = vector.load %arg7[%c1_55, %c0_56, %c0_57] : memref<9x16x32xf32, #tpu.memory_space<vmem>>, vector<1x16x32xf32>
      %159 = vector.shape_cast %158 : vector<1x16x32xf32> to vector<16x32xf32>
      %160 = vector.shape_cast %157 : vector<16x32xf32> to vector<1x16x32xf32>
      tpu.vector_store %arg7[%c1_55, %c0_56, %c0_57], %160 {strides = array<i32>} : memref<9x16x32xf32, #tpu.memory_space<vmem>>, vector<1x16x32xf32>,
      %c-1_i32_58 = arith.constant -1 : i32
      %161 = vector.broadcast %c-1_i32_58 : i32 to vector<16x32xi32>
      %162 = arith.addi %91, %161 : vector<16x32xi32>
      %c0_i32_59 = arith.constant 0 : i32
      %163 = vector.broadcast %c0_i32_59 : i32 to vector<16x32xi32>
      %164 = arith.cmpi sge, %162, %163 : vector<16x32xi32>
      %c-1_i32_60 = arith.constant -1 : i32
      %165 = vector.broadcast %c-1_i32_60 : i32 to vector<16x32xi32>
      %166 = arith.addi %91, %165 : vector<16x32xi32>
      %c16_i32_61 = arith.constant 16 : i32
      %167 = vector.broadcast %c16_i32_61 : i32 to vector<16x32xi32>
      %168 = arith.cmpi slt, %166, %167 : vector<16x32xi32>
      %169 = arith.andi %164, %168 : vector<16x32xi1>
      %c1_i32_62 = arith.constant 1 : i32
      %170 = vector.broadcast %c1_i32_62 : i32 to vector<16x32xi32>
      %171 = arith.addi %108, %170 : vector<16x32xi32>
      %c0_i32_63 = arith.constant 0 : i32
      %172 = vector.broadcast %c0_i32_63 : i32 to vector<16x32xi32>
      %173 = arith.cmpi sge, %171, %172 : vector<16x32xi32>
      %174 = arith.andi %169, %173 : vector<16x32xi1>
      %c1_i32_64 = arith.constant 1 : i32
      %175 = vector.broadcast %c1_i32_64 : i32 to vector<16x32xi32>
      %176 = arith.addi %108, %175 : vector<16x32xi32>
      %c16_i32_65 = arith.constant 16 : i32
      %177 = vector.broadcast %c16_i32_65 : i32 to vector<16x32xi32>
      %178 = arith.cmpi slt, %176, %177 : vector<16x32xi32>
      %179 = arith.andi %174, %178 : vector<16x32xi1>
      %c2_66 = arith.constant 2 : index
      %180 = memref.load %arg2[%c2_66] : memref<9xf32, #tpu.memory_space<smem>>
      %cst_67 = arith.constant 0.000000e+00 : f32
      %181 = vector.broadcast %180 : f32 to vector<16x32xf32>
      %182 = vector.broadcast %cst_67 : f32 to vector<16x32xf32>
      %183 = arith.select %179, %181, %182 : vector<16x32xi1>, vector<16x32xf32>
      %c2_68 = arith.constant 2 : index
      %c0_69 = arith.constant 0 : index
      %c0_70 = arith.constant 0 : index
      %184 = vector.load %arg7[%c2_68, %c0_69, %c0_70] : memref<9x16x32xf32, #tpu.memory_space<vmem>>, vector<1x16x32xf32>
      %185 = vector.shape_cast %184 : vector<1x16x32xf32> to vector<16x32xf32>
      %186 = vector.shape_cast %183 : vector<16x32xf32> to vector<1x16x32xf32>
      tpu.vector_store %arg7[%c2_68, %c0_69, %c0_70], %186 {strides = array<i32>} : memref<9x16x32xf32, #tpu.memory_space<vmem>>, vector<1x16x32xf32>,
      %c0_i32_71 = arith.constant 0 : i32
      %187 = vector.broadcast %c0_i32_71 : i32 to vector<16x32xi32>
      %188 = arith.addi %91, %187 : vector<16x32xi32>
      %c0_i32_72 = arith.constant 0 : i32
      %189 = vector.broadcast %c0_i32_72 : i32 to vector<16x32xi32>
      %190 = arith.cmpi sge, %188, %189 : vector<16x32xi32>
      %c0_i32_73 = arith.constant 0 : i32
      %191 = vector.broadcast %c0_i32_73 : i32 to vector<16x32xi32>
      %192 = arith.addi %91, %191 : vector<16x32xi32>
      %c16_i32_74 = arith.constant 16 : i32
      %193 = vector.broadcast %c16_i32_74 : i32 to vector<16x32xi32>
      %194 = arith.cmpi slt, %192, %193 : vector<16x32xi32>
      %195 = arith.andi %190, %194 : vector<16x32xi1>
      %c-1_i32_75 = arith.constant -1 : i32
      %196 = vector.broadcast %c-1_i32_75 : i32 to vector<16x32xi32>
      %197 = arith.addi %108, %196 : vector<16x32xi32>
      %c0_i32_76 = arith.constant 0 : i32
      %198 = vector.broadcast %c0_i32_76 : i32 to vector<16x32xi32>
      %199 = arith.cmpi sge, %197, %198 : vector<16x32xi32>
      %200 = arith.andi %195, %199 : vector<16x32xi1>
      %c-1_i32_77 = arith.constant -1 : i32
      %201 = vector.broadcast %c-1_i32_77 : i32 to vector<16x32xi32>
      %202 = arith.addi %108, %201 : vector<16x32xi32>
      %c16_i32_78 = arith.constant 16 : i32
      %203 = vector.broadcast %c16_i32_78 : i32 to vector<16x32xi32>
      %204 = arith.cmpi slt, %202, %203 : vector<16x32xi32>
      %205 = arith.andi %200, %204 : vector<16x32xi1>
      %c3_79 = arith.constant 3 : index
      %206 = memref.load %arg2[%c3_79] : memref<9xf32, #tpu.memory_space<smem>>
      %cst_80 = arith.constant 0.000000e+00 : f32
      %207 = vector.broadcast %206 : f32 to vector<16x32xf32>
      %208 = vector.broadcast %cst_80 : f32 to vector<16x32xf32>
      %209 = arith.select %205, %207, %208 : vector<16x32xi1>, vector<16x32xf32>
      %c3_81 = arith.constant 3 : index
      %c0_82 = arith.constant 0 : index
      %c0_83 = arith.constant 0 : index
      %210 = vector.load %arg7[%c3_81, %c0_82, %c0_83] : memref<9x16x32xf32, #tpu.memory_space<vmem>>, vector<1x16x32xf32>
      %211 = vector.shape_cast %210 : vector<1x16x32xf32> to vector<16x32xf32>
      %212 = vector.shape_cast %209 : vector<16x32xf32> to vector<1x16x32xf32>
      tpu.vector_store %arg7[%c3_81, %c0_82, %c0_83], %212 {strides = array<i32>} : memref<9x16x32xf32, #tpu.memory_space<vmem>>, vector<1x16x32xf32>,
      %c0_i32_84 = arith.constant 0 : i32
      %213 = vector.broadcast %c0_i32_84 : i32 to vector<16x32xi32>
      %214 = arith.addi %91, %213 : vector<16x32xi32>
      %c0_i32_85 = arith.constant 0 : i32
      %215 = vector.broadcast %c0_i32_85 : i32 to vector<16x32xi32>
      %216 = arith.cmpi sge, %214, %215 : vector<16x32xi32>
      %c0_i32_86 = arith.constant 0 : i32
      %217 = vector.broadcast %c0_i32_86 : i32 to vector<16x32xi32>
      %218 = arith.addi %91, %217 : vector<16x32xi32>
      %c16_i32_87 = arith.constant 16 : i32
      %219 = vector.broadcast %c16_i32_87 : i32 to vector<16x32xi32>
      %220 = arith.cmpi slt, %218, %219 : vector<16x32xi32>
      %221 = arith.andi %216, %220 : vector<16x32xi1>
      %c0_i32_88 = arith.constant 0 : i32
      %222 = vector.broadcast %c0_i32_88 : i32 to vector<16x32xi32>
      %223 = arith.addi %108, %222 : vector<16x32xi32>
      %c0_i32_89 = arith.constant 0 : i32
      %224 = vector.broadcast %c0_i32_89 : i32 to vector<16x32xi32>
      %225 = arith.cmpi sge, %223, %224 : vector<16x32xi32>
      %226 = arith.andi %221, %225 : vector<16x32xi1>
      %c0_i32_90 = arith.constant 0 : i32
      %227 = vector.broadcast %c0_i32_90 : i32 to vector<16x32xi32>
      %228 = arith.addi %108, %227 : vector<16x32xi32>
      %c16_i32_91 = arith.constant 16 : i32
      %229 = vector.broadcast %c16_i32_91 : i32 to vector<16x32xi32>
      %230 = arith.cmpi slt, %228, %229 : vector<16x32xi32>
      %231 = arith.andi %226, %230 : vector<16x32xi1>
      %c4_92 = arith.constant 4 : index
      %232 = memref.load %arg2[%c4_92] : memref<9xf32, #tpu.memory_space<smem>>
      %cst_93 = arith.constant 0.000000e+00 : f32
      %233 = vector.broadcast %232 : f32 to vector<16x32xf32>
      %234 = vector.broadcast %cst_93 : f32 to vector<16x32xf32>
      %235 = arith.select %231, %233, %234 : vector<16x32xi1>, vector<16x32xf32>
      %c4_94 = arith.constant 4 : index
      %c0_95 = arith.constant 0 : index
      %c0_96 = arith.constant 0 : index
      %236 = vector.load %arg7[%c4_94, %c0_95, %c0_96] : memref<9x16x32xf32, #tpu.memory_space<vmem>>, vector<1x16x32xf32>
      %237 = vector.shape_cast %236 : vector<1x16x32xf32> to vector<16x32xf32>
      %238 = vector.shape_cast %235 : vector<16x32xf32> to vector<1x16x32xf32>
      tpu.vector_store %arg7[%c4_94, %c0_95, %c0_96], %238 {strides = array<i32>} : memref<9x16x32xf32, #tpu.memory_space<vmem>>, vector<1x16x32xf32>,
      %c0_i32_97 = arith.constant 0 : i32
      %239 = vector.broadcast %c0_i32_97 : i32 to vector<16x32xi32>
      %240 = arith.addi %91, %239 : vector<16x32xi32>
      %c0_i32_98 = arith.constant 0 : i32
      %241 = vector.broadcast %c0_i32_98 : i32 to vector<16x32xi32>
      %242 = arith.cmpi sge, %240, %241 : vector<16x32xi32>
      %c0_i32_99 = arith.constant 0 : i32
      %243 = vector.broadcast %c0_i32_99 : i32 to vector<16x32xi32>
      %244 = arith.addi %91, %243 : vector<16x32xi32>
      %c16_i32_100 = arith.constant 16 : i32
      %245 = vector.broadcast %c16_i32_100 : i32 to vector<16x32xi32>
      %246 = arith.cmpi slt, %244, %245 : vector<16x32xi32>
      %247 = arith.andi %242, %246 : vector<16x32xi1>
      %c1_i32_101 = arith.constant 1 : i32
      %248 = vector.broadcast %c1_i32_101 : i32 to vector<16x32xi32>
      %249 = arith.addi %108, %248 : vector<16x32xi32>
      %c0_i32_102 = arith.constant 0 : i32
      %250 = vector.broadcast %c0_i32_102 : i32 to vector<16x32xi32>
      %251 = arith.cmpi sge, %249, %250 : vector<16x32xi32>
      %252 = arith.andi %247, %251 : vector<16x32xi1>
      %c1_i32_103 = arith.constant 1 : i32
      %253 = vector.broadcast %c1_i32_103 : i32 to vector<16x32xi32>
      %254 = arith.addi %108, %253 : vector<16x32xi32>
      %c16_i32_104 = arith.constant 16 : i32
      %255 = vector.broadcast %c16_i32_104 : i32 to vector<16x32xi32>
      %256 = arith.cmpi slt, %254, %255 : vector<16x32xi32>
      %257 = arith.andi %252, %256 : vector<16x32xi1>
      %c5_105 = arith.constant 5 : index
      %258 = memref.load %arg2[%c5_105] : memref<9xf32, #tpu.memory_space<smem>>
      %cst_106 = arith.constant 0.000000e+00 : f32
      %259 = vector.broadcast %258 : f32 to vector<16x32xf32>
      %260 = vector.broadcast %cst_106 : f32 to vector<16x32xf32>
      %261 = arith.select %257, %259, %260 : vector<16x32xi1>, vector<16x32xf32>
      %c5_107 = arith.constant 5 : index
      %c0_108 = arith.constant 0 : index
      %c0_109 = arith.constant 0 : index
      %262 = vector.load %arg7[%c5_107, %c0_108, %c0_109] : memref<9x16x32xf32, #tpu.memory_space<vmem>>, vector<1x16x32xf32>
      %263 = vector.shape_cast %262 : vector<1x16x32xf32> to vector<16x32xf32>
      %264 = vector.shape_cast %261 : vector<16x32xf32> to vector<1x16x32xf32>
      tpu.vector_store %arg7[%c5_107, %c0_108, %c0_109], %264 {strides = array<i32>} : memref<9x16x32xf32, #tpu.memory_space<vmem>>, vector<1x16x32xf32>,
      %c1_i32_110 = arith.constant 1 : i32
      %265 = vector.broadcast %c1_i32_110 : i32 to vector<16x32xi32>
      %266 = arith.addi %91, %265 : vector<16x32xi32>
      %c0_i32_111 = arith.constant 0 : i32
      %267 = vector.broadcast %c0_i32_111 : i32 to vector<16x32xi32>
      %268 = arith.cmpi sge, %266, %267 : vector<16x32xi32>
      %c1_i32_112 = arith.constant 1 : i32
      %269 = vector.broadcast %c1_i32_112 : i32 to vector<16x32xi32>
      %270 = arith.addi %91, %269 : vector<16x32xi32>
      %c16_i32_113 = arith.constant 16 : i32
      %271 = vector.broadcast %c16_i32_113 : i32 to vector<16x32xi32>
      %272 = arith.cmpi slt, %270, %271 : vector<16x32xi32>
      %273 = arith.andi %268, %272 : vector<16x32xi1>
      %c-1_i32_114 = arith.constant -1 : i32
      %274 = vector.broadcast %c-1_i32_114 : i32 to vector<16x32xi32>
      %275 = arith.addi %108, %274 : vector<16x32xi32>
      %c0_i32_115 = arith.constant 0 : i32
      %276 = vector.broadcast %c0_i32_115 : i32 to vector<16x32xi32>
      %277 = arith.cmpi sge, %275, %276 : vector<16x32xi32>
      %278 = arith.andi %273, %277 : vector<16x32xi1>
      %c-1_i32_116 = arith.constant -1 : i32
      %279 = vector.broadcast %c-1_i32_116 : i32 to vector<16x32xi32>
      %280 = arith.addi %108, %279 : vector<16x32xi32>
      %c16_i32_117 = arith.constant 16 : i32
      %281 = vector.broadcast %c16_i32_117 : i32 to vector<16x32xi32>
      %282 = arith.cmpi slt, %280, %281 : vector<16x32xi32>
      %283 = arith.andi %278, %282 : vector<16x32xi1>
      %c6_118 = arith.constant 6 : index
      %284 = memref.load %arg2[%c6_118] : memref<9xf32, #tpu.memory_space<smem>>
      %cst_119 = arith.constant 0.000000e+00 : f32
      %285 = vector.broadcast %284 : f32 to vector<16x32xf32>
      %286 = vector.broadcast %cst_119 : f32 to vector<16x32xf32>
      %287 = arith.select %283, %285, %286 : vector<16x32xi1>, vector<16x32xf32>
      %c6_120 = arith.constant 6 : index
      %c0_121 = arith.constant 0 : index
      %c0_122 = arith.constant 0 : index
      %288 = vector.load %arg7[%c6_120, %c0_121, %c0_122] : memref<9x16x32xf32, #tpu.memory_space<vmem>>, vector<1x16x32xf32>
      %289 = vector.shape_cast %288 : vector<1x16x32xf32> to vector<16x32xf32>
      %290 = vector.shape_cast %287 : vector<16x32xf32> to vector<1x16x32xf32>
      tpu.vector_store %arg7[%c6_120, %c0_121, %c0_122], %290 {strides = array<i32>} : memref<9x16x32xf32, #tpu.memory_space<vmem>>, vector<1x16x32xf32>,
      %c1_i32_123 = arith.constant 1 : i32
      %291 = vector.broadcast %c1_i32_123 : i32 to vector<16x32xi32>
      %292 = arith.addi %91, %291 : vector<16x32xi32>
      %c0_i32_124 = arith.constant 0 : i32
      %293 = vector.broadcast %c0_i32_124 : i32 to vector<16x32xi32>
      %294 = arith.cmpi sge, %292, %293 : vector<16x32xi32>
      %c1_i32_125 = arith.constant 1 : i32
      %295 = vector.broadcast %c1_i32_125 : i32 to vector<16x32xi32>
      %296 = arith.addi %91, %295 : vector<16x32xi32>
      %c16_i32_126 = arith.constant 16 : i32
      %297 = vector.broadcast %c16_i32_126 : i32 to vector<16x32xi32>
      %298 = arith.cmpi slt, %296, %297 : vector<16x32xi32>
      %299 = arith.andi %294, %298 : vector<16x32xi1>
      %c0_i32_127 = arith.constant 0 : i32
      %300 = vector.broadcast %c0_i32_127 : i32 to vector<16x32xi32>
      %301 = arith.addi %108, %300 : vector<16x32xi32>
      %c0_i32_128 = arith.constant 0 : i32
      %302 = vector.broadcast %c0_i32_128 : i32 to vector<16x32xi32>
      %303 = arith.cmpi sge, %301, %302 : vector<16x32xi32>
      %304 = arith.andi %299, %303 : vector<16x32xi1>
      %c0_i32_129 = arith.constant 0 : i32
      %305 = vector.broadcast %c0_i32_129 : i32 to vector<16x32xi32>
      %306 = arith.addi %108, %305 : vector<16x32xi32>
      %c16_i32_130 = arith.constant 16 : i32
      %307 = vector.broadcast %c16_i32_130 : i32 to vector<16x32xi32>
      %308 = arith.cmpi slt, %306, %307 : vector<16x32xi32>
      %309 = arith.andi %304, %308 : vector<16x32xi1>
      %c7_131 = arith.constant 7 : index
      %310 = memref.load %arg2[%c7_131] : memref<9xf32, #tpu.memory_space<smem>>
      %cst_132 = arith.constant 0.000000e+00 : f32
      %311 = vector.broadcast %310 : f32 to vector<16x32xf32>
      %312 = vector.broadcast %cst_132 : f32 to vector<16x32xf32>
      %313 = arith.select %309, %311, %312 : vector<16x32xi1>, vector<16x32xf32>
      %c7_133 = arith.constant 7 : index
      %c0_134 = arith.constant 0 : index
      %c0_135 = arith.constant 0 : index
      %314 = vector.load %arg7[%c7_133, %c0_134, %c0_135] : memref<9x16x32xf32, #tpu.memory_space<vmem>>, vector<1x16x32xf32>
      %315 = vector.shape_cast %314 : vector<1x16x32xf32> to vector<16x32xf32>
      %316 = vector.shape_cast %313 : vector<16x32xf32> to vector<1x16x32xf32>
      tpu.vector_store %arg7[%c7_133, %c0_134, %c0_135], %316 {strides = array<i32>} : memref<9x16x32xf32, #tpu.memory_space<vmem>>, vector<1x16x32xf32>,
      %c1_i32_136 = arith.constant 1 : i32
      %317 = vector.broadcast %c1_i32_136 : i32 to vector<16x32xi32>
      %318 = arith.addi %91, %317 : vector<16x32xi32>
      %c0_i32_137 = arith.constant 0 : i32
      %319 = vector.broadcast %c0_i32_137 : i32 to vector<16x32xi32>
      %320 = arith.cmpi sge, %318, %319 : vector<16x32xi32>
      %c1_i32_138 = arith.constant 1 : i32
      %321 = vector.broadcast %c1_i32_138 : i32 to vector<16x32xi32>
      %322 = arith.addi %91, %321 : vector<16x32xi32>
      %c16_i32_139 = arith.constant 16 : i32
      %323 = vector.broadcast %c16_i32_139 : i32 to vector<16x32xi32>
      %324 = arith.cmpi slt, %322, %323 : vector<16x32xi32>
      %325 = arith.andi %320, %324 : vector<16x32xi1>
      %c1_i32_140 = arith.constant 1 : i32
      %326 = vector.broadcast %c1_i32_140 : i32 to vector<16x32xi32>
      %327 = arith.addi %108, %326 : vector<16x32xi32>
      %c0_i32_141 = arith.constant 0 : i32
      %328 = vector.broadcast %c0_i32_141 : i32 to vector<16x32xi32>
      %329 = arith.cmpi sge, %327, %328 : vector<16x32xi32>
      %330 = arith.andi %325, %329 : vector<16x32xi1>
      %c1_i32_142 = arith.constant 1 : i32
      %331 = vector.broadcast %c1_i32_142 : i32 to vector<16x32xi32>
      %332 = arith.addi %108, %331 : vector<16x32xi32>
      %c16_i32_143 = arith.constant 16 : i32
      %333 = vector.broadcast %c16_i32_143 : i32 to vector<16x32xi32>
      %334 = arith.cmpi slt, %332, %333 : vector<16x32xi32>
      %335 = arith.andi %330, %334 : vector<16x32xi1>
      %c8_144 = arith.constant 8 : index
      %336 = memref.load %arg2[%c8_144] : memref<9xf32, #tpu.memory_space<smem>>
      %cst_145 = arith.constant 0.000000e+00 : f32
      %337 = vector.broadcast %336 : f32 to vector<16x32xf32>
      %338 = vector.broadcast %cst_145 : f32 to vector<16x32xf32>
      %339 = arith.select %335, %337, %338 : vector<16x32xi1>, vector<16x32xf32>
      %c8_146 = arith.constant 8 : index
      %c0_147 = arith.constant 0 : index
      %c0_148 = arith.constant 0 : index
      %340 = vector.load %arg7[%c8_146, %c0_147, %c0_148] : memref<9x16x32xf32, #tpu.memory_space<vmem>>, vector<1x16x32xf32>
      %341 = vector.shape_cast %340 : vector<1x16x32xf32> to vector<16x32xf32>
      %342 = vector.shape_cast %339 : vector<16x32xf32> to vector<1x16x32xf32>
      tpu.vector_store %arg7[%c8_146, %c0_147, %c0_148], %342 {strides = array<i32>} : memref<9x16x32xf32, #tpu.memory_space<vmem>>, vector<1x16x32xf32>,
      %c0_149 = arith.constant 0 : index
      %c0_150 = arith.constant 0 : index
      %343 = vector.load %arg4[%c0_149, %c0_150] : memref<16x32xf32, #tpu.memory_space<vmem>>, vector<16x32xf32>
      %c0_151 = arith.constant 0 : index
      %c0_152 = arith.constant 0 : index
      %344 = vector.load %arg6[%c0_151, %c0_152] : memref<16x32xf32, #tpu.memory_space<vmem>>, vector<16x32xf32>
      tpu.vector_store %arg6[%c0_151, %c0_152], %343 {strides = array<i32>} : memref<16x32xf32, #tpu.memory_space<vmem>>, vector<16x32xf32>,
    } else {
    }
    %c0 = arith.constant 0 : index
    %c0_1 = arith.constant 0 : index
    %3 = vector.load %arg6[%c0, %c0_1] : memref<16x32xf32, #tpu.memory_space<vmem>>, vector<16x32xf32>
    %cst = arith.constant 0.000000e+00 : f32
    %4 = vector.broadcast %cst : f32 to vector<16x32xf32>
    %5 = vector.extract_strided_slice %3 {offsets = [15, 0], sizes = [1, 32], strides = [1, 1]} : vector<16x32xf32> to vector<1x32xf32>
    %6 = vector.extract_strided_slice %3 {offsets = [0, 0], sizes = [15, 32], strides = [1, 1]} : vector<16x32xf32> to vector<15x32xf32>
    %7 = tpu.concatenate %5, %6 in 0 : vector<1x32xf32>, vector<15x32xf32> -> vector<16x32xf32>
    %8 = vector.extract_strided_slice %7 {offsets = [0, 31], sizes = [16, 1], strides = [1, 1]} : vector<16x32xf32> to vector<16x1xf32>
    %9 = vector.extract_strided_slice %7 {offsets = [0, 0], sizes = [16, 31], strides = [1, 1]} : vector<16x32xf32> to vector<16x31xf32>
    %10 = tpu.concatenate %8, %9 in 1 : vector<16x1xf32>, vector<16x31xf32> -> vector<16x32xf32>
    %c0_2 = arith.constant 0 : index
    %c0_3 = arith.constant 0 : index
    %c0_4 = arith.constant 0 : index
    %11 = vector.load %arg7[%c0_2, %c0_3, %c0_4] : memref<9x16x32xf32, #tpu.memory_space<vmem>>, vector<1x16x32xf32>
    %12 = vector.shape_cast %11 : vector<1x16x32xf32> to vector<16x32xf32>
    %13 = arith.mulf %10, %12 : vector<16x32xf32>
    %14 = arith.addf %4, %13 : vector<16x32xf32>
    %15 = vector.extract_strided_slice %3 {offsets = [15, 0], sizes = [1, 32], strides = [1, 1]} : vector<16x32xf32> to vector<1x32xf32>
    %16 = vector.extract_strided_slice %3 {offsets = [0, 0], sizes = [15, 32], strides = [1, 1]} : vector<16x32xf32> to vector<15x32xf32>
    %17 = tpu.concatenate %15, %16 in 0 : vector<1x32xf32>, vector<15x32xf32> -> vector<16x32xf32>
    %c1 = arith.constant 1 : index
    %c0_5 = arith.constant 0 : index
    %c0_6 = arith.constant 0 : index
    %18 = vector.load %arg7[%c1, %c0_5, %c0_6] : memref<9x16x32xf32, #tpu.memory_space<vmem>>, vector<1x16x32xf32>
    %19 = vector.shape_cast %18 : vector<1x16x32xf32> to vector<16x32xf32>
    %20 = arith.mulf %17, %19 : vector<16x32xf32>
    %21 = arith.addf %14, %20 : vector<16x32xf32>
    %22 = vector.extract_strided_slice %3 {offsets = [15, 0], sizes = [1, 32], strides = [1, 1]} : vector<16x32xf32> to vector<1x32xf32>
    %23 = vector.extract_strided_slice %3 {offsets = [0, 0], sizes = [15, 32], strides = [1, 1]} : vector<16x32xf32> to vector<15x32xf32>
    %24 = tpu.concatenate %22, %23 in 0 : vector<1x32xf32>, vector<15x32xf32> -> vector<16x32xf32>
    %25 = vector.extract_strided_slice %24 {offsets = [0, 1], sizes = [16, 31], strides = [1, 1]} : vector<16x32xf32> to vector<16x31xf32>
    %26 = vector.extract_strided_slice %24 {offsets = [0, 0], sizes = [16, 1], strides = [1, 1]} : vector<16x32xf32> to vector<16x1xf32>
    %27 = tpu.concatenate %25, %26 in 1 : vector<16x31xf32>, vector<16x1xf32> -> vector<16x32xf32>
    %c2 = arith.constant 2 : index
    %c0_7 = arith.constant 0 : index
    %c0_8 = arith.constant 0 : index
    %28 = vector.load %arg7[%c2, %c0_7, %c0_8] : memref<9x16x32xf32, #tpu.memory_space<vmem>>, vector<1x16x32xf32>
    %29 = vector.shape_cast %28 : vector<1x16x32xf32> to vector<16x32xf32>
    %30 = arith.mulf %27, %29 : vector<16x32xf32>
    %31 = arith.addf %21, %30 : vector<16x32xf32>
    %32 = vector.extract_strided_slice %3 {offsets = [0, 31], sizes = [16, 1], strides = [1, 1]} : vector<16x32xf32> to vector<16x1xf32>
    %33 = vector.extract_strided_slice %3 {offsets = [0, 0], sizes = [16, 31], strides = [1, 1]} : vector<16x32xf32> to vector<16x31xf32>
    %34 = tpu.concatenate %32, %33 in 1 : vector<16x1xf32>, vector<16x31xf32> -> vector<16x32xf32>
    %c3 = arith.constant 3 : index
    %c0_9 = arith.constant 0 : index
    %c0_10 = arith.constant 0 : index
    %35 = vector.load %arg7[%c3, %c0_9, %c0_10] : memref<9x16x32xf32, #tpu.memory_space<vmem>>, vector<1x16x32xf32>
    %36 = vector.shape_cast %35 : vector<1x16x32xf32> to vector<16x32xf32>
    %37 = arith.mulf %34, %36 : vector<16x32xf32>
    %38 = arith.addf %31, %37 : vector<16x32xf32>
    %c4 = arith.constant 4 : index
    %c0_11 = arith.constant 0 : index
    %c0_12 = arith.constant 0 : index
    %39 = vector.load %arg7[%c4, %c0_11, %c0_12] : memref<9x16x32xf32, #tpu.memory_space<vmem>>, vector<1x16x32xf32>
    %40 = vector.shape_cast %39 : vector<1x16x32xf32> to vector<16x32xf32>
    %41 = arith.mulf %3, %40 : vector<16x32xf32>
    %42 = arith.addf %38, %41 : vector<16x32xf32>
    %43 = vector.extract_strided_slice %3 {offsets = [0, 1], sizes = [16, 31], strides = [1, 1]} : vector<16x32xf32> to vector<16x31xf32>
    %44 = vector.extract_strided_slice %3 {offsets = [0, 0], sizes = [16, 1], strides = [1, 1]} : vector<16x32xf32> to vector<16x1xf32>
    %45 = tpu.concatenate %43, %44 in 1 : vector<16x31xf32>, vector<16x1xf32> -> vector<16x32xf32>
    %c5 = arith.constant 5 : index
    %c0_13 = arith.constant 0 : index
    %c0_14 = arith.constant 0 : index
    %46 = vector.load %arg7[%c5, %c0_13, %c0_14] : memref<9x16x32xf32, #tpu.memory_space<vmem>>, vector<1x16x32xf32>
    %47 = vector.shape_cast %46 : vector<1x16x32xf32> to vector<16x32xf32>
    %48 = arith.mulf %45, %47 : vector<16x32xf32>
    %49 = arith.addf %42, %48 : vector<16x32xf32>
    %50 = vector.extract_strided_slice %3 {offsets = [1, 0], sizes = [15, 32], strides = [1, 1]} : vector<16x32xf32> to vector<15x32xf32>
    %51 = vector.extract_strided_slice %3 {offsets = [0, 0], sizes = [1, 32], strides = [1, 1]} : vector<16x32xf32> to vector<1x32xf32>
    %52 = tpu.concatenate %50, %51 in 0 : vector<15x32xf32>, vector<1x32xf32> -> vector<16x32xf32>
    %53 = vector.extract_strided_slice %52 {offsets = [0, 31], sizes = [16, 1], strides = [1, 1]} : vector<16x32xf32> to vector<16x1xf32>
    %54 = vector.extract_strided_slice %52 {offsets = [0, 0], sizes = [16, 31], strides = [1, 1]} : vector<16x32xf32> to vector<16x31xf32>
    %55 = tpu.concatenate %53, %54 in 1 : vector<16x1xf32>, vector<16x31xf32> -> vector<16x32xf32>
    %c6 = arith.constant 6 : index
    %c0_15 = arith.constant 0 : index
    %c0_16 = arith.constant 0 : index
    %56 = vector.load %arg7[%c6, %c0_15, %c0_16] : memref<9x16x32xf32, #tpu.memory_space<vmem>>, vector<1x16x32xf32>
    %57 = vector.shape_cast %56 : vector<1x16x32xf32> to vector<16x32xf32>
    %58 = arith.mulf %55, %57 : vector<16x32xf32>
    %59 = arith.addf %49, %58 : vector<16x32xf32>
    %60 = vector.extract_strided_slice %3 {offsets = [1, 0], sizes = [15, 32], strides = [1, 1]} : vector<16x32xf32> to vector<15x32xf32>
    %61 = vector.extract_strided_slice %3 {offsets = [0, 0], sizes = [1, 32], strides = [1, 1]} : vector<16x32xf32> to vector<1x32xf32>
    %62 = tpu.concatenate %60, %61 in 0 : vector<15x32xf32>, vector<1x32xf32> -> vector<16x32xf32>
    %c7 = arith.constant 7 : index
    %c0_17 = arith.constant 0 : index
    %c0_18 = arith.constant 0 : index
    %63 = vector.load %arg7[%c7, %c0_17, %c0_18] : memref<9x16x32xf32, #tpu.memory_space<vmem>>, vector<1x16x32xf32>
    %64 = vector.shape_cast %63 : vector<1x16x32xf32> to vector<16x32xf32>
    %65 = arith.mulf %62, %64 : vector<16x32xf32>
    %66 = arith.addf %59, %65 : vector<16x32xf32>
    %67 = vector.extract_strided_slice %3 {offsets = [1, 0], sizes = [15, 32], strides = [1, 1]} : vector<16x32xf32> to vector<15x32xf32>
    %68 = vector.extract_strided_slice %3 {offsets = [0, 0], sizes = [1, 32], strides = [1, 1]} : vector<16x32xf32> to vector<1x32xf32>
    %69 = tpu.concatenate %67, %68 in 0 : vector<15x32xf32>, vector<1x32xf32> -> vector<16x32xf32>
    %70 = vector.extract_strided_slice %69 {offsets = [0, 1], sizes = [16, 31], strides = [1, 1]} : vector<16x32xf32> to vector<16x31xf32>
    %71 = vector.extract_strided_slice %69 {offsets = [0, 0], sizes = [16, 1], strides = [1, 1]} : vector<16x32xf32> to vector<16x1xf32>
    %72 = tpu.concatenate %70, %71 in 1 : vector<16x31xf32>, vector<16x1xf32> -> vector<16x32xf32>
    %c8 = arith.constant 8 : index
    %c0_19 = arith.constant 0 : index
    %c0_20 = arith.constant 0 : index
    %73 = vector.load %arg7[%c8, %c0_19, %c0_20] : memref<9x16x32xf32, #tpu.memory_space<vmem>>, vector<1x16x32xf32>
    %74 = vector.shape_cast %73 : vector<1x16x32xf32> to vector<16x32xf32>
    %75 = arith.mulf %72, %74 : vector<16x32xf32>
    %76 = arith.addf %66, %75 : vector<16x32xf32>
    %c0_21 = arith.constant 0 : index
    %77 = memref.load %arg3[%c0_21] : memref<1xf32, #tpu.memory_space<smem>>
    %78 = vector.broadcast %77 : f32 to vector<16x32xf32>
    %79 = arith.subf %76, %78 : vector<16x32xf32>
    %cst_22 = arith.constant 1.000000e+02 : f32
    %80 = vector.broadcast %cst_22 : f32 to vector<16x32xf32>
    %81 = arith.mulf %80, %79 : vector<16x32xf32>
    %82 = arith.negf %81 : vector<16x32xf32>
    %83 = math.exp %82 : vector<16x32xf32>
    %cst_23 = arith.constant 1.000000e+00 : f32
    %84 = vector.broadcast %cst_23 : f32 to vector<16x32xf32>
    %85 = arith.addf %84, %83 : vector<16x32xf32>
    %86 = arith.divf %84, %85 : vector<16x32xf32>
    %c0_24 = arith.constant 0 : index
    %c0_25 = arith.constant 0 : index
    %87 = vector.load %arg6[%c0_24, %c0_25] : memref<16x32xf32, #tpu.memory_space<vmem>>, vector<16x32xf32>
    tpu.vector_store %arg6[%c0_24, %c0_25], %86 {strides = array<i32>} : memref<16x32xf32, #tpu.memory_space<vmem>>, vector<16x32xf32>,
    %c0_26 = arith.constant 0 : index
    %c0_27 = arith.constant 0 : index
    %c0_28 = arith.constant 0 : index
    %88 = vector.load %arg5[%c0_26, %c0_27, %c0_28] : memref<1x16x32xf32, #tpu.memory_space<vmem>>, vector<1x16x32xf32>
    %89 = vector.shape_cast %88 : vector<1x16x32xf32> to vector<16x32xf32>
    %90 = vector.shape_cast %86 : vector<16x32xf32> to vector<1x16x32xf32>
    tpu.vector_store %arg5[%c0_26, %c0_27, %c0_28], %90 {strides = array<i32>} : memref<1x16x32xf32, #tpu.memory_space<vmem>>, vector<1x16x32xf32>,
    return
  }
  func.func @transform_0(%arg0: i32, %arg1: i32) -> i32 {
    %c0_i32 = arith.constant 0 : i32
    %c0_i32_0 = arith.constant 0 : i32
    return %c0_i32 : i32
  }
  func.func @transform_1(%arg0: i32, %arg1: i32) -> i32 {
    %c0_i32 = arith.constant 0 : i32
    %c0_i32_0 = arith.constant 0 : i32
    return %c0_i32 : i32
  }
  func.func @transform_2(%arg0: i32, %arg1: i32) -> (i32, i32) {
    %c0_i32 = arith.constant 0 : i32
    %c0_i32_0 = arith.constant 0 : i32
    return %c0_i32, %arg0 : i32, i32
  }
  func.func @transform_3(%arg0: i32, %arg1: i32) -> (i32, i32, i32) {
    %c0_i32 = arith.constant 0 : i32
    %c0_i32_0 = arith.constant 0 : i32
    return %arg1, %c0_i32, %arg0 : i32, i32, i32
  }
}

</mosaic_0001>

<bundles_post_ra>
// kernel: tpu_custom_call.1
= control target key start
LH: loop header
LB: loop body
LE: loop exit
PB: predicated region body
PF: predicated region fallthrough
CT: control target
= control target key end

     0   :  { %s1212_s0 = inlined_call_operand.vmem [shape: f32[9], index: 0, kind: input, shape index: {}]   ;;  %s1213_s1 = inlined_call_operand.<no memory space> [shape: f32[1], index: 1, kind: input, shape index: {}]   ;;  %s1214_s2 = inlined_call_operand.hbm [shape: f32[16,32], index: 2, kind: input, shape index: {}]   ;;  %s1215_s3 = inlined_call_operand.hbm [shape: f32[3,16,32], index: 3, kind: output, shape index: {}]  }
   0x1   :  { %8 = sst [smem:[#allocation4]] %s1213_s1 }
   0x2   :  { %9 = vsyncpa [#allocation8], 0 }
   0x3   :  { %10 = vsyncpa [#allocation6], 0 }
   0x4   :  { %11 = vsyncpa [#allocation7], 0 }
   0x5   :  { %13 = vsyncpa [#allocation7 + $0x1], 0  ;;  %s931_s14 = smov 0   ;;  %s933_s15 = smov 0  }
   0x6   :  { %s935_s16 = smov 0   ;;  %s937_s17 = smov 0  }
   0x7   :  { %s939_s18 = smov 0   ;;  %s941_s19 = smov 0  }
   0x8 LB: > { %s648_s1 = sadd.s32 4294967295, %s895_s19   ;;  %s649_s20 = sadd.s32 4294967294, %s895_s19   ;;  %s895_s19 = sphi %s941_s19, %s19_s19   ;;  %s891_s18 = sphi %s939_s18, %s1228_s18   ;;  %s887_s17 = sphi %s937_s17, %s1227_s17   ;;  %s883_s16 = sphi %s935_s16, %s1226_s16   ;;  %s879_s15 = sphi %s933_s15, %s1225_s15   ;;  %s875_s14 = sphi %s931_s14, %s1224_s14  }
   0x9   : > { %s28_s21 = sadd.s32 1, %s891_s18  ;;  %s108_s22 = sadd.s32 1, %s883_s16 }
   0xa   : > { %p29_p0 = scmp.ge.s32.totalorder %s28_s21, 3  ;;  %p118_p1 = scmp.ne.s32.totalorder %s883_s16, %s879_s15 }
   0xb   : > { %p119_p2 = scmp.eq.s32.totalorder %s648_s1, 2  ;;  %p124_p3 = scmp.ne.s32.totalorder %s879_s15, %s875_s14 }
   0xc   : > { %s1230_s21 = smov (%p29_p0, %s28_s21), 0  ;;  %p125_p5 = scmp.eq.s32.totalorder %s649_s20, 2 }
   0xd   : > { %p971_p4 = por %p119_p2, %p118_p1  ;;  %s103_s24 = ssub.s32 %s891_s18, %s1230_s21 }
   0xe   : > { %p650_p6 = scmp.ge.s32.totalorder %s895_s19, 1  ;;  %p106_p7 = scmp.eq.s32.totalorder %s103_s24, 0 }
   0xf   : > { %s1217_s23 = scalar_select %p971_p4, 1, 0 }
  0x10   : > { %p978_p8 = por %p125_p5, %p124_p3  ;;  %p132_p9 = scmp.lt.s32.totalorder %s895_s19, 4 }
  0x11   : > { %s984_s26 = scalar_select %p106_p7, %s883_s16, %s108_s22  }
  0x12   : > { %s1218_s25 = scalar_select %p978_p8, 1, 0 }
  0x13   : > { %p986_p10 = pnand %p650_p6, %p132_p9  ;;  %p990_p11 = scmp.eq.s32.totalorder %s648_s1, 0 }
  0x14   : > { %s145_s4 = sshll.u32 %s1212_s0, 4  ;;  %s897_s6 = smov [#allocation9]   ;;  %s146_s4 = int_to_ptr.vmem [resolvable:$true] %s145_s4 }
  0x15   : > { %p684_p12 = pneg %p986_p10  ;;  %s160_s7 = sshll.u32 %s897_s6, 4  ;;  %s1005_s7 = int_to_ptr.vmem [resolvable:$true] %s160_s7 }
  0x16   : > { %s766_s8 = scalar_lea.vmem %s146_s4, 16  ;;  %p774_p5 = scmp.lt.s32.totalorder %s146_s4, %s146_s4 }
  0x17   : > { %p1001_p13 = pnand %p990_p11, %p684_p12  ;;  %p767_p0 = scmp.ne.s32.totalorder %s146_s4, %s766_s8 }
  0x18   : > { %p775_p6 = scmp.lt.s32.totalorder %s766_s8, %s766_s8 }
  0x19   : > { %p768_p1 = pneg %p1001_p13 }
  0x1a   : > { %p776_p7 = por %p775_p6, %p774_p5 }
  0x1b   : > { %p769_p2 = pnand %p768_p1, %p767_p0 }
  0x1d   : > { %p770_p3 = pneg %p769_p2 }
  0x1f   : > { %p777_p9 = pnand %p776_p7, %p770_p3 }
  0x21   : > { %780 = shalt.err (!%p777_p9)
}
  0x22   : > { %s898_s9 = smov [#allocation5]   ;;  %s781_s12 = scalar_lea.hbm %s1214_s2, 256 }
  0x23   : > { %687 = dma.vmem_to_smem (!%p1001_p13), %s146_s4, 16, %s898_s9, [#allocation8]  }
  0x24   : > { %p782_p12 = scmp.ne.s32.totalorder %s1214_s2, %s781_s12  ;;  %p788_p3 = scmp.lt.u32.totalorder %s781_s12, %s1214_s2 }
  0x26   : > { %p784_p0 = pnand %p782_p12, %p768_p1 }
  0x28   : > { %p785_p2 = pneg %p784_p0 }
  0x2a   : > { %p790_p5 = pnand %p788_p3, %p785_p2 }
  0x2c   : > { %793 = shalt.err (!%p790_p5)
}
  0x2d   : > { %s794_s24 = scalar_lea.vmem %s1005_s7, 256  ;;  %p802_p8 = scmp.lt.s32.totalorder %s1005_s7, %s1005_s7 }
  0x2e   : > { %p795_p6 = scmp.ne.s32.totalorder %s1005_s7, %s794_s24  ;;  %p803_p12 = scmp.lt.s32.totalorder %s794_s24, %s794_s24 }
  0x30   : > { %p797_p7 = pnand %p795_p6, %p768_p1  ;;  %p804_p0 = por %p803_p12, %p802_p8 }
  0x32   : > { %p798_p9 = pneg %p797_p7 }
  0x34   : > { %p805_p4 = pnand %p804_p0, %p798_p9 }
  0x36   : > { %808 = shalt.err (!%p805_p4)
}
  0x37   : > { %s899_s29 = smov 128   ;;  %s900_s30 = smov 8  }
  0x38   : > { %690 = dma.hbm_to_vmem [thread:$0]  (!%p1001_p13), %s1214_s2, 256, %s1005_s7, [#allocation6], %s899_s29, %s899_s29, %s900_s30  }
  0x39   : > { %176 = sbr.rel (%p986_p10) target bundleno = 305 (0x131), region = 32 }
  0x40   : > { %862 = dma.done.wait (%p990_p11), [#allocation8], 16  }
  0x41   : > { %864 = vsyncadd (%p990_p11), [#allocation8], 4294967280 }
  0x42   : > { %866 = dma.done.wait (%p990_p11), [#allocation6], 256  }
  0x43   : > { %868 = vsyncadd (%p990_p11), [#allocation6], 4294967040 }
  0x44   : > { %186 = sfence }
  0x45   : > { %s197_s5 = sand.u32 1, %s879_s15   ;;  %p657_p4 = scmp.ne.s32.totalorder %s887_s17, 0 }
  0x46   : > { %s656_s7 = sshll.u32 %s197_s5, 4  ;;  %v204_v0 = vlaneseq (!%p657_p4)  ;;  %s1055_s8 = sld [smem:[#allocation5]] (!%p657_p4)  ;;  %vm240_vm0 = vcmask (!%p657_p4), 261120   ;;  %v350_v1 = vld [vmem:[#allocation9] sm:$0xff] (!%p657_p4)  ;;  %v351_v2 = vld [vmem:[#allocation9 + $0x8] sm:$0xff] (!%p657_p4) }
  0x47   : > { %s1052_s27 = scalar_lea.vmem [#allocation10], %s656_s7  ;;  %203 = sbr.rel (%p657_p4) target bundleno = 91 (0x5b), region = 44  ;;  %352 = vst.msk [vmem:[#allocation2] sm:$0xff] (!%p657_p4), %vm240_vm0, %v350_v1  ;;  %353 = vst.msk [vmem:[#allocation2 + $0x8] sm:$0xff] (!%p657_p4), %vm240_vm0, %v351_v2 }
  0x48   : > { %s658_s9 = sld [smem:[#allocation5 + $0x1]] (!%p657_p4)  ;;  %s1057_s10 = sld [smem:[#allocation5 + $0x2]] (!%p657_p4)  ;;  %v205_v3 = vshrl.u32 (!%p657_p4), %v204_v0, 7  ;;  %v208_v4 = vand.u32 (!%p657_p4), 127, %v204_v0 }
  0x49   : > { %s1059_s28 = sld [smem:[#allocation5 + $0x3]] (!%p657_p4)  ;;  %s661_s11 = sld [smem:[#allocation5 + $0x4]] (!%p657_p4) }
  0x4a   : > { %s1062_s12 = sld [smem:[#allocation5 + $0x5]] (!%p657_p4)  ;;  %s1065_s13 = sld [smem:[#allocation5 + $0x6]] (!%p657_p4)  ;;  %v213_v5 = vand.u32 (!%p657_p4), 15, %v208_v4  ;;  %v221_v6 = vadd.s32 (!%p657_p4), 4294967295, %v205_v3  ;;  %v206_v7 = vadd.s32 (!%p657_p4), 8, %v205_v3 }
  0x4b   : > { %s1067_s1 = sld [smem:[#allocation5 + $0x7]] (!%p657_p4)  ;;  %s1069_s20 = sld [smem:[#allocation5 + $0x8]] (!%p657_p4) }
  0x4c   : > { %vm223_vm1 = vcmp.ge.s32.totalorder (!%p657_p4), %v221_v6, 0  ;;  %v229_v8 = vadd.s32 (!%p657_p4), 4294967295, %v213_v5  ;;  %v237_v9 = vstv (!%p657_p4), %s1055_s8  ;;  %v256_v12 = vadd.s32 (!%p657_p4), 1, %v213_v5 }
  0x4d   : > { %v310_v17 = vadd.s32 (!%p657_p4), 1, %v206_v7 }
  0x4e   : > { %v250_v10 = vstv %s658_s9  ;;  %v264_v13 = vstv %s1057_s10  ;;  %vm230_vm2 = vcmp.ge.s32.totalorder %v229_v8, 0  ;;  %vm260_vm4 = vcmp.lt.s32.totalorder %v256_v12, 16 }
  0x4f   : > { %v251_v11 = vsel %vm223_vm1, %v250_v10, 0.0  ;;  %255 = vst.msk [vmem:[#allocation3 + $0x18] sm:$0xff] %vm240_vm0, %v250_v10  ;;  %v281_v14 = vstv %s1059_s28  ;;  %v292_v15 = vstv %s661_s11  ;;  %vm231_vm3 = vmand %vm223_vm1, %vm230_vm2  ;;  %v239_v18 = vsel %vm230_vm2, %v237_v9, 0.0 }
  0x50   : > { %254 = vst.msk [vmem:[#allocation3 + $0x10] sm:$0xff] %vm240_vm0, %v251_v11  ;;  %v303_v16 = vstv %s1062_s12  ;;  %v282_v19 = vsel %vm230_vm2, %v281_v14, 0.0  ;;  %296 = vst.msk [vmem:[#allocation3 + $0x40] sm:$0xff] %vm240_vm0, %v292_v15  ;;  %v322_v20 = vstv %s1065_s13  ;;  %v238_v21 = vsel %vm231_vm3, %v237_v9, 0.0 }
  0x51   : > { %297 = vst.msk [vmem:[#allocation3 + $0x48] sm:$0xff] %vm240_vm0, %v292_v15  ;;  %242 = vst.msk [vmem:[#allocation3 + $0x8] sm:$0xff] %vm240_vm0, %v239_v18  ;;  %v266_v22 = vsel %vm260_vm4, %v264_v13, 0.0  ;;  %v304_v23 = vsel %vm260_vm4, %v303_v16, 0.0  ;;  %v323_v24 = vsel %vm230_vm2, %v322_v20, 0.0  ;;  %vm314_vm6 = vcmp.lt.s32.totalorder %v310_v17, 16 }
  0x52   : > { %vm261_vm5 = vmand %vm223_vm1, %vm260_vm4  ;;  %285 = vst.msk [vmem:[#allocation3 + $0x30] sm:$0xff] %vm240_vm0, %v282_v19  ;;  %v333_v26 = vstv %s1067_s1  ;;  %v344_v27 = vstv %s1069_s20 }
  0x53   : > { %286 = vst.msk [vmem:[#allocation3 + $0x38] sm:$0xff] %vm240_vm0, %v282_v19  ;;  %241 = vst.msk [vmem:[#allocation3] sm:$0xff] %vm240_vm0, %v238_v21  ;;  %v265_v25 = vsel %vm261_vm5, %v264_v13, 0.0  ;;  %v335_v28 = vsel %vm314_vm6, %v333_v26, 0.0  ;;  %v345_v29 = vsel %vm260_vm4, %v344_v27, 0.0 }
  0x54   : > { %269 = vst.msk [vmem:[#allocation3 + $0x28] sm:$0xff] %vm240_vm0, %v266_v22  ;;  %307 = vst.msk [vmem:[#allocation3 + $0x50] sm:$0xff] %vm240_vm0, %v304_v23 }
  0x55   : > { %308 = vst.msk [vmem:[#allocation3 + $0x58] sm:$0xff] %vm240_vm0, %v304_v23  ;;  %326 = vst.msk [vmem:[#allocation3 + $0x60] sm:$0xff] %vm240_vm0, %v323_v24 }
  0x56   : > { %268 = vst.msk [vmem:[#allocation3 + $0x20] sm:$0xff] %vm240_vm0, %v265_v25  ;;  %vm318_vm7 = vmand %vm314_vm6, %vm230_vm2 }
  0x57   : > { %337 = vst.msk [vmem:[#allocation3 + $0x70] sm:$0xff] %vm240_vm0, %v333_v26  ;;  %v324_v30 = vsel %vm318_vm7, %v322_v20, 0.0  ;;  %338 = vst.msk [vmem:[#allocation3 + $0x78] sm:$0xff] %vm240_vm0, %v335_v28 }
  0x58   : > { %348 = vst.msk [vmem:[#allocation3 + $0x80] sm:$0xff] %vm240_vm0, %v345_v29  ;;  %vm342_vm8 = vmand %vm314_vm6, %vm260_vm4 }
  0x59   : > { %327 = vst.msk [vmem:[#allocation3 + $0x68] sm:$0xff] %vm240_vm0, %v324_v30  ;;  %v346_v31 = vsel %vm342_vm8, %v344_v27, 0.0 }
  0x5a   : > { %349 = vst.msk [vmem:[#allocation3 + $0x88] sm:$0xff] %vm240_vm0, %v346_v31 }
  0x5b PF: > { %v1109_v32 = vld [vmem:[#allocation2] sm:$0xff]  ;;  %v1111_v33 = vld [vmem:[#allocation2 + $0x8] sm:$0xff]  ;;  %vm360_vm9 = vcmask 1040384   ;;  %s901_s22 = smov 1   ;;  %s902_s24 = smov 97   ;;  %vm466_vm10 = vcmask 1046528  }
  0x5c   : > { %v357_v34 = vrot.slane %v1111_v33, 7  ;;  %v361_v35 = vrot.slane %v1109_v32, 7  ;;  %s903_s29 = smov 127   ;;  %s904_s30 = smov 31   ;;  %v467_v38 = vrot.slane %v1109_v32, 1  ;;  %v468_v39 = vrot.slane %v1111_v33, 1 }
  0x5d   : > { %vm379_vm11 = vcmask 7168   ;;  %v382_v52 = vld [vmem:[#allocation3] sm:$0xff]  ;;  %vm407_vm12 = vcmask 252928   ;;  %v389_v55 = vld [vmem:[#allocation3 + $0x10] sm:$0xff]  ;;  %v383_v57 = vld [vmem:[#allocation3 + $0x8] sm:$0xff]  ;;  %s524_s4 = sld [smem:[#allocation4]] }
  0x5e   : > { %v365_v36 = vsel %vm360_vm9, %v357_v34, %v361_v35  ;;  %v362_v37 = vsel %vm360_vm9, %v361_v35, %v357_v34  ;;  %v1125_v40 = vsel %vm466_vm10, %v468_v39, %v467_v38  ;;  %v1127_v41 = vsel %vm466_vm10, %v467_v38, %v468_v39  ;;  %v390_v58 = vld [vmem:[#allocation3 + $0x18] sm:$0xff]  ;;  %v412_v60 = vld [vmem:[#allocation3 + $0x28] sm:$0xff]  ;;  %v411_v62 = vld [vmem:[#allocation3 + $0x20] sm:$0xff]  ;;  %s673_s6 = sshll.u32 %s887_s17, 8  ;;  %s562_s7 = sshll.u32 %s1052_s27, 4  ;;  %s1160_s7 = int_to_ptr.vmem [resolvable:$true] %s562_s7 }
  0x5f   : > { %373 = vrot.lane.b32.xlu1 %v365_v36, %s901_s22  ;;  %367 = vrot.lane.b32.xlu0 %v365_v36, %s902_s24  ;;  %v391_v1 = vmul.f32 %v389_v55, %v365_v36  ;;  %v392_v3 = vmul.f32 %v390_v58, %v362_v37  ;;  %v433_v6 = vld [vmem:[#allocation3 + $0x38] sm:$0xff]  ;;  %v432_v8 = vld [vmem:[#allocation3 + $0x30] sm:$0xff]  ;;  %v440_v18 = vld [vmem:[#allocation3 + $0x48] sm:$0xff]  ;;  %vm542_vm13 = vcmask 261120   ;;  %s1158_s10 = scalar_lea.hbm %s1215_s3, %s673_s6  ;;  %s1166_s17 = scalar_lea.sflag [#allocation7], %s197_s5 }
  0x60   : > { %v439_v19 = vld [vmem:[#allocation3 + $0x40] sm:$0xff]  ;;  %v461_v22 = vld [vmem:[#allocation3 + $0x58] sm:$0xff]  ;;  %v460_v24 = vld [vmem:[#allocation3 + $0x50] sm:$0xff]  ;;  %v442_v28 = vmul.f32 %v440_v18, %v1111_v33  ;;  %s809_s28 = scalar_lea.vmem %s1160_s7, 256  ;;  %p1222_p10 = scmp.ne.s32.totalorder %s1217_s23, 0 }
  0x61   : > { %v441_v29 = vmul.f32 %v439_v19, %v1109_v32  ;;  %v491_v38 = vld [vmem:[#allocation3 + $0x68] sm:$0xff]  ;;  %v490_v39 = vld [vmem:[#allocation3 + $0x60] sm:$0xff]  ;;  %p810_p8 = scmp.ne.s32.totalorder %s1160_s7, %s809_s28  ;;  %s905_s11 = smov [#allocation10]  }
  0x62   : > { %v519_v58 = vld [vmem:[#allocation3 + $0x88] sm:$0xff]  ;;  %s813_s12 = sshll.u32 %s905_s11, 4  ;;  %s814_s12 = int_to_ptr.vmem [resolvable:$false] %s813_s12 }
  0x63   : > { %375 = vrot.lane.b32.xlu1 %v362_v37, %s901_s22  ;;  %369 = vrot.lane.b32.xlu0 %v362_v37, %s902_s24  ;;  %p811_p11 = pnand %p810_p8, %p1222_p10  ;;  %s815_s13 = scalar_lea.vmem %s814_s12, 512 }
  0x64   : > { %p816_p1 = scmp.lt.s32.totalorder %s1160_s7, %s814_s12  ;;  %p817_p2 = scmp.lt.s32.totalorder %s815_s13, %s809_s28 }
  0x65   : > { %p812_p13 = pneg %p811_p11 }
  0x66   : > { %p818_p3 = por %p817_p2, %p816_p1 }
  0x67   : > { %397 = vrot.lane.b32.xlu1 %v362_v37, %s903_s29  ;;  %395 = vrot.lane.b32.xlu0 %v365_v36, %s903_s29 }
  0x68   : > { %p819_p5 = pnand %p818_p3, %p812_p13 }
  0x6b   : > { %403 = vrot.lane.b32.xlu1 %v362_v37, %s904_s30  ;;  %401 = vrot.lane.b32.xlu0 %v365_v36, %s904_s30  ;;  %v498_v36 = vld [vmem:[#allocation3 + $0x78] sm:$0xff]  ;;  %v497_v37 = vld [vmem:[#allocation3 + $0x70] sm:$0xff] }
  0x6f   : > { %419 = vrot.lane.b32.xlu1 %v1111_v33, %s902_s24  ;;  %417 = vrot.lane.b32.xlu0 %v1109_v32, %s902_s24 }
  0x73   : > { %425 = vrot.lane.b32.xlu1 %v1111_v33, %s901_s22  ;;  %423 = vrot.lane.b32.xlu0 %v1109_v32, %s901_s22 }
  0x77   : > { %447 = vrot.lane.b32.xlu1 %v1111_v33, %s903_s29  ;;  %445 = vrot.lane.b32.xlu0 %v1109_v32, %s903_s29 }
  0x7b   : > { %453 = vrot.lane.b32.xlu1 %v1111_v33, %s904_s30  ;;  %451 = vrot.lane.b32.xlu0 %v1109_v32, %s904_s30  ;;  %v500_v33 = vmul.f32 %v498_v36, %v1125_v40  ;;  %v499_v32 = vmul.f32 %v497_v37, %v1127_v41 }
  0x7f   : > { %477 = vrot.lane.b32.xlu1 %v1125_v40, %s902_s24  ;;  %475 = vrot.lane.b32.xlu0 %v1127_v41, %s902_s24 }
  0x83   : > { %483 = vrot.lane.b32.xlu1 %v1125_v40, %s901_s22  ;;  %481 = vrot.lane.b32.xlu0 %v1127_v41, %s901_s22 }
  0x87   : > { %505 = vrot.lane.b32.xlu1 %v1125_v40, %s903_s29  ;;  %503 = vrot.lane.b32.xlu0 %v1127_v41, %s903_s29 }
  0x8b   : > { %511 = vrot.lane.b32.xlu1 %v1125_v40, %s904_s30  ;;  %509 = vrot.lane.b32.xlu0 %v1127_v41, %s904_s30 }
  0xd1   : > { %v374_v42 = vpop.permute.xlu1 %373  ;;  %v368_v43 = vpop.permute.xlu0 %367 }
  0xd2   : > { %v380_v56 = vsel %vm379_vm11, %v368_v43, %v374_v42 }
  0xd3   : > { %v384_v0 = vmul.f32 %v382_v52, %v380_v56 }
  0xd5   : > { %v376_v44 = vpop.permute.xlu1 %375  ;;  %v370_v45 = vpop.permute.xlu0 %369  ;;  %v393_v12 = vadd.f32 %v391_v1, %v384_v0  ;;  %v525_v0 = vstv %s524_s4 }
  0xd6   : > { %v381_v59 = vsel %vm379_vm11, %v370_v45, %v376_v44 }
  0xd7   : > { %v385_v2 = vmul.f32 %v383_v57, %v381_v59  ;;  %v518_v59 = vld [vmem:[#allocation3 + $0x80] sm:$0xff] }
  0xd9   : > { %v398_v46 = vpop.permute.xlu1 %397  ;;  %v396_v47 = vpop.permute.xlu0 %395  ;;  %v394_v13 = vadd.f32 %v392_v3, %v385_v2 }
  0xdd   : > { %v404_v48 = vpop.permute.xlu1 %403  ;;  %v402_v49 = vpop.permute.xlu0 %401 }
  0xde   : > { %v409_v61 = vsel %vm407_vm12, %v398_v46, %v404_v48  ;;  %v408_v63 = vsel %vm407_vm12, %v396_v47, %v402_v49 }
  0xdf   : > { %v414_v10 = vmul.f32 %v412_v60, %v409_v61  ;;  %v413_v11 = vmul.f32 %v411_v62, %v408_v63 }
  0xe1   : > { %v420_v50 = vpop.permute.xlu1 %419  ;;  %v418_v51 = vpop.permute.xlu0 %417  ;;  %v416_v20 = vadd.f32 %v414_v10, %v394_v13  ;;  %v415_v21 = vadd.f32 %v413_v11, %v393_v12 }
  0xe5   : > { %v426_v53 = vpop.permute.xlu1 %425  ;;  %v424_v54 = vpop.permute.xlu0 %423 }
  0xe6   : > { %v430_v7 = vsel %vm379_vm11, %v420_v50, %v426_v53  ;;  %v429_v9 = vsel %vm379_vm11, %v418_v51, %v424_v54 }
  0xe7   : > { %v435_v14 = vmul.f32 %v433_v6, %v430_v7  ;;  %v434_v15 = vmul.f32 %v432_v8, %v429_v9 }
  0xe9   : > { %v448_v4 = vpop.permute.xlu1 %447  ;;  %v446_v5 = vpop.permute.xlu0 %445  ;;  %v437_v26 = vadd.f32 %v435_v14, %v416_v20  ;;  %v436_v27 = vadd.f32 %v434_v15, %v415_v21 }
  0xeb   : > { %v444_v42 = vadd.f32 %v442_v28, %v437_v26  ;;  %v443_v43 = vadd.f32 %v441_v29, %v436_v27 }
  0xed   : > { %v454_v16 = vpop.permute.xlu1 %453  ;;  %v452_v17 = vpop.permute.xlu0 %451 }
  0xee   : > { %v458_v23 = vsel %vm407_vm12, %v448_v4, %v454_v16  ;;  %v457_v25 = vsel %vm407_vm12, %v446_v5, %v452_v17 }
  0xef   : > { %v463_v34 = vmul.f32 %v461_v22, %v458_v23  ;;  %v462_v35 = vmul.f32 %v460_v24, %v457_v25 }
  0xf1   : > { %v478_v30 = vpop.permute.xlu1 %477  ;;  %v476_v31 = vpop.permute.xlu0 %475  ;;  %v465_v48 = vadd.f32 %v463_v34, %v444_v42  ;;  %v464_v49 = vadd.f32 %v462_v35, %v443_v43 }
  0xf5   : > { %v484_v44 = vpop.permute.xlu1 %483  ;;  %v482_v45 = vpop.permute.xlu0 %481 }
  0xf6   : > { %v488_v46 = vsel %vm379_vm11, %v478_v30, %v484_v44  ;;  %v487_v47 = vsel %vm379_vm11, %v476_v31, %v482_v45 }
  0xf7   : > { %v493_v50 = vmul.f32 %v491_v38, %v488_v46  ;;  %v492_v51 = vmul.f32 %v490_v39, %v487_v47 }
  0xf9   : > { %v495_v52 = vadd.f32 %v493_v50, %v465_v48  ;;  %v494_v53 = vadd.f32 %v492_v51, %v464_v49  ;;  %v506_v54 = vpop.permute.xlu1 %505  ;;  %v504_v55 = vpop.permute.xlu0 %503 }
  0xfb   : > { %v502_v56 = vadd.f32 %v500_v33, %v495_v52  ;;  %v501_v57 = vadd.f32 %v499_v32, %v494_v53 }
  0xfd   : > { %v512_v60 = vpop.permute.xlu1 %511  ;;  %v510_v61 = vpop.permute.xlu0 %509 }
  0xfe   : > { %v516_v62 = vsel %vm407_vm12, %v506_v54, %v512_v60  ;;  %v515_v40 = vsel %vm407_vm12, %v504_v55, %v510_v61 }
  0xff   : > { %v521_v41 = vmul.f32 %v519_v58, %v516_v62  ;;  %v520_v63 = vmul.f32 %v518_v59, %v515_v40 }
 0x101   : > { %v523_v1 = vadd.f32 %v521_v41, %v502_v56  ;;  %v522_v2 = vadd.f32 %v520_v63, %v501_v57 }
 0x103   : > { %v527_v3 = vsub.f32 %v523_v1, %v525_v0  ;;  %v526_v4 = vsub.f32 %v522_v2, %v525_v0 }
 0x105   : > { %v667_v5 = vmul.f32 -100.0, %v527_v3  ;;  %v666_v6 = vmul.f32 -100.0, %v526_v4 }
 0x107   : > { %v534_v7 = vmul.f32 1.442695, %v667_v5  ;;  %v532_v8 = vmul.f32 1.442695, %v666_v6 }
 0x109   : > { %758 = vpow2.f32 %v534_v7 }
 0x10a   : > { %760 = vpow2.f32 %v532_v8 }
 0x113   : > { %v759_v9 = vpop.eup %758 }
 0x114   : > { %v761_v10 = vpop.eup %760  ;;  %v537_v11 = vadd.f32 1.0, %v759_v9 }
 0x115   : > { %v536_v12 = vadd.f32 1.0, %v761_v10 }
 0x116   : > { %762 = vrcp.f32 %v537_v11 }
 0x117   : > { %764 = vrcp.f32 %v536_v12 }
 0x120   : > { %v763_v13 = vpop.eup %762 }
 0x121   : > { %v765_v14 = vpop.eup %764  ;;  %544 = vst.msk [vmem:[#allocation2 + $0x8] sm:$0xff] %vm542_vm13, %v763_v13  ;;  %546 = vst.msk [vmem:[%s1052_s27 + $0x8] sm:$0xff] %vm542_vm13, %v763_v13 }
 0x122   : > { %543 = vst.msk [vmem:[#allocation2] sm:$0xff] %vm542_vm13, %v765_v14  ;;  %545 = vst.msk [vmem:[%s1052_s27] sm:$0xff] %vm542_vm13, %v765_v14 }
 0x123   : > { %822 = shalt.err (!%p819_p5)
}
 0x124   : > { %s823_s5 = scalar_lea.hbm %s1158_s10, 256  ;;  %s827_s20 = scalar_lea.hbm %s1215_s3, 768 }
 0x125   : > { %p824_p6 = scmp.ne.s32.totalorder %s1158_s10, %s823_s5  ;;  %p828_p12 = scmp.lt.u32.totalorder %s1158_s10, %s1215_s3 }
 0x126   : > { %p829_p0 = scmp.lt.u32.totalorder %s827_s20, %s823_s5  ;;  %p831_p8 = scmp.lt.u32.totalorder %s823_s5, %s1158_s10 }
 0x127   : > { %p825_p7 = pnand %p824_p6, %p1222_p10 }
 0x128   : > { %p830_p4 = por %p829_p0, %p828_p12 }
 0x129   : > { %p826_p9 = pneg %p825_p7 }
 0x12a   : > { %p832_p11 = por %p831_p8, %p830_p4 }
 0x12c   : > { %p833_p13 = pnand %p832_p11, %p826_p9 }
 0x12e   : > { %836 = shalt.err (!%p833_p13)
}
 0x12f   : > { %s906_s29 = smov 128   ;;  %s907_s30 = smov 8  }
 0x130   : > { %682 = dma.vmem_to_hbm [thread:$0]  (%p1222_p10), %s1160_s7, 256, %s1158_s10, %s1166_s17, %s906_s29, %s906_s29, %s907_s30  }
 0x131 PF: > { %p699_p1 = scmp.ge.s32.totalorder %s895_s19, 2  ;;  %s577_s4 = sand.u32 1, %s875_s14  }
 0x132   : > { %p1223_p2 = scmp.ne.s32.totalorder %s1218_s25, 0  ;;  %s578_s6 = scalar_lea.sflag [#allocation7], %s577_s4 }
 0x134   : > { %p692_p3 = pnand %p699_p1, %p1223_p2 }
 0x136   : > { %870 = dma.done.wait (!%p692_p3), %s578_s6, 256  }
 0x137   : > { %872 = vsyncadd (!%p692_p3), %s578_s6, 4294967040  ;;  %s19_s19 = sadd.s32 1, %s895_s19   ;;  %s1224_s14 = smov %s879_s15 }
 0x138   : > { %p16_p5 = scmp.ge.s32.totalorder %s19_s19, 5   ;;  %s1225_s15 = smov %s883_s16 }
 0x139   : > { %s1226_s16 = smov %s984_s26  ;;  %s1227_s17 = smov %s891_s18 }
 0x13a   : > { %s1228_s18 = smov %s1230_s21  ;;  %18 = sbr.rel (!%p16_p5) target bundleno = 8 (0x8), region = 95 }
 0x141   :  { %583 = vsyncpa [#allocation6], 1 }
 0x142   :  { %585 = vsyncpa [#allocation6 + $0x1], 1 }
 0x143   :  { %586 = vsyncpa [#allocation7], 1 }
 0x144   :  { %588 = vsyncpa [#allocation7 + $0x1], 1 }
 0x145   :  { %589 = vsyncpa [#allocation8], 1 }
 0x146   :  { %591 = vsyncpa [#allocation8 + $0x1], 1 }

</bundles_post_ra>
